<compile_context>
chip_gen: v7x
topology: tpu7x:2x2x1
jax: 0.10.0
libtpu: 0.0.40
codegen_flags: <defaults>
</compile_context>

<pallas_src>
import functools

import jax
import jax.numpy as jnp
from jax.experimental import pallas as pl
from jax.experimental.pallas import tpu as pltpu

_MIB = 1024 * 1024


def _round_up(x, m):
    return (x + m - 1) // m * m


def _sublane_multiple(dtype):
    # f32 -> 8, bf16/f16 -> 16, int8/fp8 -> 32 packed sublane rows.
    return 8 * max(1, 4 // jnp.dtype(dtype).itemsize)


def _pack_lanes(x, d):
    """(R, d) -> (R*d/128, 128) lane packing (d must divide 128).

    Rows are contiguous so this is a pure reshape when R*d % 128 == 0; otherwise
    a handful (< 128/d) of zero rows are appended (zero rows contribute nothing
    to the Gram or column sums, and we always normalize by the true row count).
    """
    m = 128 // d
    r = x.shape[0]
    pad = (-r) % m
    if pad:
        x = jnp.pad(x, ((0, pad), (0, 0)))
    return x.reshape(((r + pad) * d) // 128, 128)


def _block_rows(n, cap, multiple, max_rows):
    """Rows per block: whole segment if it fits, else a sublane-multiple tile."""
    if n <= cap and n <= max_rows:
        return n                       # single full block -> no tail masking
    tb = min(cap, max_rows, n)
    return max(multiple, (tb // multiple) * multiple)


def _accumulate(ref, gb, start, n_blocks, n_rows, tb, s_acc, cs_acc):
    """Accumulate X_blk^T X_blk and column sums for one segment's row blocks.

    `gb` is the global block index; this segment owns blocks [start, start+n_blocks).
    """
    active = (gb >= start) & (gb < start + n_blocks)
    rem = n_rows % tb                  # static Python int

    def do(x):
        # Un-centered Gram contribution: X_blk^T @ X_blk (MXU, f32 accumulate).
        s_acc[...] += jax.lax.dot_general(
            x, x, dimension_numbers=(((0,), (0,)), ((), ())),
            preferred_element_type=jnp.float32)
        # Column-sum contribution folded onto the MXU (ones-row matvec) instead
        # of a per-step VPU astype + cross-sublane reduce.
        ones = jnp.ones((1, x.shape[0]), x.dtype)
        cs_acc[...] += jax.lax.dot_general(
            ones, x, dimension_numbers=(((1,), (0,)), ((), ())),
            preferred_element_type=jnp.float32)

    if rem == 0:
        # Every block of this segment is full: no masking anywhere (static).
        @pl.when(active)
        def _():
            do(ref[...])
    else:
        # Fast path: all but the last block are full -> unmasked dot.
        @pl.when(active & (gb < start + n_blocks - 1))
        def _():
            do(ref[...])

        # Last (partial) block only: mask out-of-bounds tail rows with a select
        # (keep jnp.where -- it safely discards whatever the padded tail holds).
        @pl.when(active & (gb == start + n_blocks - 1))
        def _():
            x = ref[...]
            rows = jax.lax.broadcasted_iota(jnp.int32, x.shape, 0)
            do(jnp.where(rows < rem, x, jnp.zeros_like(x)))


def _gram_kernel(p_ref, qi_ref, qk_ref, s_ref, cs_ref, *,
                 per_core, seg_starts, seg_blocks, seg_rows, seg_tbs):
    c = pl.program_id(0)               # "parallel" axis (split across TCs on v7x)
    i = pl.program_id(1)               # "arbitrary" reduction axis
    gb = c * per_core + i              # global block index

    @pl.when(i == 0)
    def _init():
        s_ref[...] = jnp.zeros_like(s_ref)
        cs_ref[...] = jnp.zeros_like(cs_ref)

    for ref, start, nb, nrows, tb in zip(
            (p_ref, qi_ref, qk_ref), seg_starts, seg_blocks, seg_rows, seg_tbs):
        _accumulate(ref, gb, start, nb, nrows, tb, s_ref, cs_ref)


def _finalize_kernel(s_ref, cs_ref, out_ref, *, d, dp, total_rows):
    # Combine per-core partial accumulators.
    s_p = jnp.sum(s_ref[...], axis=0)          # (dp, dp)
    cs_p = jnp.sum(cs_ref[...], axis=0)        # (1, dp)

    if dp != d:
        # Unfold the lane packing: the true Gram / column-sum are the sums of
        # the (dp/d) diagonal d x d blocks / d-wide chunks.  Done with a
        # block-diagonal mask + a "fold" matmul (no unaligned sub-lane slices).
        rr = jax.lax.broadcasted_iota(jnp.int32, (dp, dp), 0)
        cc = jax.lax.broadcasted_iota(jnp.int32, (dp, dp), 1)
        s_p = jnp.where((rr // d) == (cc // d), s_p, 0.0)
        fi = jax.lax.broadcasted_iota(jnp.int32, (d, dp), 0)
        fc = jax.lax.broadcasted_iota(jnp.int32, (d, dp), 1)
        fold = ((fc % d) == fi).astype(jnp.float32)      # (d, dp) = [I_d I_d ...]
        t = jax.lax.dot_general(s_p, fold, (((1,), (1,)), ((), ())),
                                preferred_element_type=jnp.float32)   # (dp, d)
        s = jax.lax.dot_general(fold, t, (((1,), (0,)), ((), ())),
                                preferred_element_type=jnp.float32)   # (d, d)
        cs = jax.lax.dot_general(cs_p, fold, (((1,), (1,)), ((), ())),
                                 preferred_element_type=jnp.float32)  # (1, d)
    else:
        s, cs = s_p, cs_p

    inv_r = jnp.float32(1.0 / total_rows)
    mean = cs * inv_r                                     # (1, d)
    outer = jax.lax.dot_general(mean, mean, (((0,), (0,)), ((), ())),
                                preferred_element_type=jnp.float32)   # (d, d)
    cov = s * inv_r - outer
    ri = jax.lax.broadcasted_iota(jnp.int32, (d, d), 0)
    ci = jax.lax.broadcasted_iota(jnp.int32, (d, d), 1)
    sq = cov * cov
    # ||C||_F^2 - ||diag(C)||^2 == sum of squared off-diagonal entries.
    out_ref[0, 0] = jnp.sum(jnp.where(ri != ci, sq, jnp.zeros_like(sq)))


def covariance_loss(p_u, q_i, q_k, *, num_parts=2, max_block_rows=4096):
    """Pallas TPU forward of Covariance_loss. Returns a scalar float32."""
    d = int(p_u.shape[-1])
    q_k2 = q_k.reshape(q_k.shape[0] * q_k.shape[1], -1)
    assert int(q_i.shape[-1]) == d and int(q_k2.shape[-1]) == d
    r1, r2, r3 = int(p_u.shape[0]), int(q_i.shape[0]), int(q_k2.shape[0])
    assert min(r1, r2, r3) > 0
    total_rows = r1 + r2 + r3          # true row count used for normalization

    # ---- lane packing for narrow feature dims --------------------------------
    do_pack = (d < 128) and (128 % d == 0)
    if do_pack:
        xs = [_pack_lanes(x, d) for x in (p_u, q_i, q_k2)]
        dp = 128
    else:
        xs = [p_u, q_i, q_k2]
        dp = d
    seg_rows = tuple(int(x.shape[0]) for x in xs)        # packed row counts

    # ---- per-generation VMEM budget & per-segment block sizing ----------------
    try:
        vmem_cap = int(pltpu.get_tpu_info().vmem_capacity_bytes)  # 128 MiB v5e/v6e, 64 MiB v7x
    except Exception:
        vmem_cap = 64 * _MIB            # conservative (v7x) fallback

    dp_lane = _round_up(dp, 128)
    # Double-buffered output accumulator blocks (Gram + colsum, f32).
    acc_bytes = 2 * 4 * (dp_lane * dp_lane + 8 * dp_lane)
    input_budget = max(4 * _MIB, int(0.40 * vmem_cap) - acc_bytes)
    # TODO(synk): for dp >= 2048 the (dp, dp) accumulator should be panel-tiled
    # over an extra grid axis to fit v7x's 64 MiB VMEM.

    tot_packed = sum(seg_rows)
    tbs, grids = [], []
    for x, n in zip(xs, seg_rows):
        itemsize = jnp.dtype(x.dtype).itemsize
        mult = _sublane_multiple(x.dtype)
        # Apportion the input budget by segment size (hot segment gets most).
        budget = max(input_budget * n // tot_packed, 2 * mult * dp_lane * itemsize)
        cap = max(mult, budget // (2 * dp_lane * itemsize))
        tbs.append(_block_rows(n, cap, mult, max_block_rows))
        grids.append(pl.cdiv(n, tbs[-1]))

    g1, g2, g3 = grids
    nb = g1 + g2 + g3
    num_parts = max(1, min(int(num_parts), nb))
    per_core = pl.cdiv(nb, num_parts)
    starts = (0, g1, g1 + g2)

    def make_map(start, g):
        def idx(c, i):
            gb = c * per_core + i
            # Clamp so an inactive segment keeps the same block index (no re-fetch).
            return (jnp.clip(gb - start, 0, g - 1), 0)
        return idx

    in_specs = [pl.BlockSpec((tb, dp), make_map(st, g))
                for tb, st, g in zip(tbs, starts, grids)]
    out_specs = [
        pl.BlockSpec((None, dp, dp), lambda c, i: (c, 0, 0)),   # partial Gram per part
        pl.BlockSpec((None, 1, dp), lambda c, i: (c, 0, 0)),    # partial colsum per part
    ]

    in_bytes = sum(2 * tb * dp_lane * jnp.dtype(x.dtype).itemsize
                   for tb, x in zip(tbs, xs))
    vmem_needed = in_bytes + acc_bytes + 2 * _MIB
    vmem_limit = int(min(int(0.75 * vmem_cap), max(32 * _MIB, vmem_needed)))

    kernel = functools.partial(
        _gram_kernel, per_core=per_core, seg_starts=starts,
        seg_blocks=tuple(grids), seg_rows=seg_rows, seg_tbs=tuple(tbs))

    s_part, cs_part = pl.pallas_call(
        kernel,
        out_shape=(jax.ShapeDtypeStruct((num_parts, dp, dp), jnp.float32),
                   jax.ShapeDtypeStruct((num_parts, 1, dp), jnp.float32)),
        grid_spec=pltpu.PrefetchScalarGridSpec(
            num_scalar_prefetch=0,
            grid=(num_parts, per_core),
            in_specs=in_specs,
            out_specs=out_specs,
        ),
        compiler_params=pltpu.CompilerParams(
            dimension_semantics=("parallel", "arbitrary"),
            vmem_limit_bytes=vmem_limit,
        ),
        cost_estimate=pl.CostEstimate(
            flops=2 * tot_packed * dp * dp + 2 * tot_packed * dp,
            transcendentals=0,
            bytes_accessed=sum(int(x.size) * jnp.dtype(x.dtype).itemsize for x in xs)
                           + num_parts * (dp * dp + dp) * 4,
        ),
    )(*xs)

    # ---- tiny finalize kernel: combine parts, unfold packing, compute loss ----
    fin_bytes = 2 * num_parts * (dp_lane * dp_lane + 8 * dp_lane) * 4 + 4 * _MIB
    fin = functools.partial(_finalize_kernel, d=d, dp=dp, total_rows=total_rows)
    out = pl.pallas_call(
        fin,
        out_shape=jax.ShapeDtypeStruct((1, 1), jnp.float32),
        grid_spec=pltpu.PrefetchScalarGridSpec(
            num_scalar_prefetch=0,
            grid=(1,),
            in_specs=[pl.BlockSpec((num_parts, dp, dp), lambda i: (0, 0, 0)),
                      pl.BlockSpec((num_parts, 1, dp), lambda i: (0, 0, 0))],
            out_specs=pl.BlockSpec(memory_space=pltpu.MemorySpace.SMEM),
        ),
        compiler_params=pltpu.CompilerParams(
            dimension_semantics=("arbitrary",),
            vmem_limit_bytes=int(min(int(0.75 * vmem_cap), max(32 * _MIB, fin_bytes))),
        ),
    )(s_part, cs_part)
    return out[0, 0]


def covariance_loss_ref(p_u, q_i, q_k):
    q_k2 = q_k.reshape(q_k.shape[0] * q_k.shape[1], -1)
    x = jnp.concatenate([p_u, q_i, q_k2], axis=0).astype(jnp.float32)
    n = x.shape[0]
    mean = jnp.mean(x, axis=0)
    xc = x - mean
    cov = (xc.T @ xc) / n
    return jnp.sum(cov * cov) - jnp.sum(jnp.diag(cov) ** 2)


if __name__ == "__main__":
    key = jax.random.PRNGKey(0)
    k1, k2, k3 = jax.random.split(key, 3)
    D = 32
    p_u = jax.random.normal(k1, (12, D), dtype=jnp.float32)    # users
    q_i = jax.random.normal(k2, (8, D), dtype=jnp.float32)     # pos items
    q_k = jax.random.normal(k3, (4, 5, D), dtype=jnp.float32)  # neg items

    out = covariance_loss(p_u, q_i, q_k)
    out = jax.block_until_ready(out)

    ref = covariance_loss_ref(p_u, q_i, q_k)
    assert jnp.allclose(out, ref, rtol=1e-4, atol=1e-4), (out, ref)

    print("KERNEL_OK")
</pallas_src>

<mosaic_0001>
module attributes {stable_mosaic.version = 11 : i64} {
  func.func @_gram_kernel(%arg0: i32, %arg1: i32, %arg2: memref<3x128xf32, #tpu.memory_space<vmem>>, %arg3: memref<2x128xf32, #tpu.memory_space<vmem>>, %arg4: memref<5x128xf32, #tpu.memory_space<vmem>>, %arg5: memref<1x128x128xf32, #tpu.memory_space<vmem>>, %arg6: memref<1x1x128xf32, #tpu.memory_space<vmem>>) attributes {dimension_semantics = [#tpu.dimension_semantics<parallel>, #tpu.dimension_semantics<arbitrary>], iteration_bounds = array<i64: 2, 2>, scalar_prefetch = 0 : i64, scratch_operands = 0 : i64, tpu.core_type = #tpu.core_type<tc>, window_params = [{transform_indices = @transform_0, window_bounds = array<i64: 3, 128>}, {transform_indices = @transform_1, window_bounds = array<i64: 2, 128>}, {transform_indices = @transform_2, window_bounds = array<i64: 5, 128>}, {transform_indices = @transform_3, window_bounds = array<i64: 1, 128, 128>}, {transform_indices = @transform_4, window_bounds = array<i64: 1, 1, 128>}]} {
    %c2_i32 = arith.constant 2 : i32
    %0 = arith.muli %arg0, %c2_i32 : i32
    %1 = arith.addi %0, %arg1 : i32
    %c0_i32 = arith.constant 0 : i32
    %2 = arith.cmpi eq, %arg1, %c0_i32 : i32
    %3 = arith.extui %2 : i1 to i32
    %c0_i32_0 = arith.constant 0 : i32
    %4 = arith.cmpi ne, %3, %c0_i32_0 : i32
    scf.if %4 {
      %cst = arith.constant 0.000000e+00 : f32
      %20 = vector.broadcast %cst : f32 to vector<128x128xf32>
      %c0 = arith.constant 0 : index
      %c0_8 = arith.constant 0 : index
      %c0_9 = arith.constant 0 : index
      %21 = vector.load %arg5[%c0, %c0_8, %c0_9] : memref<1x128x128xf32, #tpu.memory_space<vmem>>, vector<1x128x128xf32>
      %22 = vector.shape_cast %21 : vector<1x128x128xf32> to vector<128x128xf32>
      %23 = vector.shape_cast %20 : vector<128x128xf32> to vector<1x128x128xf32>
      tpu.vector_store %arg5[%c0, %c0_8, %c0_9], %23 {strides = array<i32>} : memref<1x128x128xf32, #tpu.memory_space<vmem>>, vector<1x128x128xf32>,
      %cst_10 = arith.constant 0.000000e+00 : f32
      %24 = vector.broadcast %cst_10 : f32 to vector<1x128xf32>
      %c0_11 = arith.constant 0 : index
      %c0_12 = arith.constant 0 : index
      %c0_13 = arith.constant 0 : index
      %25 = vector.load %arg6[%c0_11, %c0_12, %c0_13] : memref<1x1x128xf32, #tpu.memory_space<vmem>>, vector<1x1x128xf32>
      %26 = vector.shape_cast %25 : vector<1x1x128xf32> to vector<1x128xf32>
      %27 = vector.shape_cast %24 : vector<1x128xf32> to vector<1x1x128xf32>
      tpu.vector_store %arg6[%c0_11, %c0_12, %c0_13], %27 {strides = array<i32>} : memref<1x1x128xf32, #tpu.memory_space<vmem>>, vector<1x1x128xf32>,
    } else {
    }
    %c0_i32_1 = arith.constant 0 : i32
    %5 = arith.cmpi sge, %1, %c0_i32_1 : i32
    %c1_i32 = arith.constant 1 : i32
    %6 = arith.cmpi slt, %1, %c1_i32 : i32
    %7 = arith.andi %5, %6 : i1
    %8 = arith.extui %7 : i1 to i32
    %c0_i32_2 = arith.constant 0 : i32
    %9 = arith.cmpi ne, %8, %c0_i32_2 : i32
    scf.if %9 {
      %c0 = arith.constant 0 : index
      %c0_8 = arith.constant 0 : index
      %20 = vector.load %arg2[%c0, %c0_8] : memref<3x128xf32, #tpu.memory_space<vmem>>, vector<3x128xf32>
      %c0_9 = arith.constant 0 : index
      %c0_10 = arith.constant 0 : index
      %c0_11 = arith.constant 0 : index
      %21 = vector.load %arg5[%c0_9, %c0_10, %c0_11] : memref<1x128x128xf32, #tpu.memory_space<vmem>>, vector<1x128x128xf32>
      %22 = vector.shape_cast %21 : vector<1x128x128xf32> to vector<128x128xf32>
      %cst = arith.constant dense<0.000000e+00> : vector<128x128xf32>
      %23 = tpu.matmul %20, %20, %cst {dimension_numbers = #tpu.dot_dimension_numbers<[0], [0], [1], [1], [0, 1, 1, 1], [], []>} : vector<3x128xf32>, vector<3x128xf32>, vector<128x128xf32> -> vector<128x128xf32>
      %24 = arith.addf %22, %23 : vector<128x128xf32>
      %c0_12 = arith.constant 0 : index
      %c0_13 = arith.constant 0 : index
      %c0_14 = arith.constant 0 : index
      %25 = vector.load %arg5[%c0_12, %c0_13, %c0_14] : memref<1x128x128xf32, #tpu.memory_space<vmem>>, vector<1x128x128xf32>
      %26 = vector.shape_cast %25 : vector<1x128x128xf32> to vector<128x128xf32>
      %27 = vector.shape_cast %24 : vector<128x128xf32> to vector<1x128x128xf32>
      tpu.vector_store %arg5[%c0_12, %c0_13, %c0_14], %27 {strides = array<i32>} : memref<1x128x128xf32, #tpu.memory_space<vmem>>, vector<1x128x128xf32>,
      %cst_15 = arith.constant 1.000000e+00 : f32
      %28 = vector.broadcast %cst_15 : f32 to vector<1x3xf32>
      %c0_16 = arith.constant 0 : index
      %c0_17 = arith.constant 0 : index
      %c0_18 = arith.constant 0 : index
      %29 = vector.load %arg6[%c0_16, %c0_17, %c0_18] : memref<1x1x128xf32, #tpu.memory_space<vmem>>, vector<1x1x128xf32>
      %30 = vector.shape_cast %29 : vector<1x1x128xf32> to vector<1x128xf32>
      %cst_19 = arith.constant dense<0.000000e+00> : vector<1x128xf32>
      %31 = tpu.matmul %28, %20, %cst_19 {dimension_numbers = #tpu.dot_dimension_numbers<[1], [0], [0], [1], [0, 0, 1, 1], [], []>} : vector<1x3xf32>, vector<3x128xf32>, vector<1x128xf32> -> vector<1x128xf32>
      %32 = arith.addf %30, %31 : vector<1x128xf32>
      %c0_20 = arith.constant 0 : index
      %c0_21 = arith.constant 0 : index
      %c0_22 = arith.constant 0 : index
      %33 = vector.load %arg6[%c0_20, %c0_21, %c0_22] : memref<1x1x128xf32, #tpu.memory_space<vmem>>, vector<1x1x128xf32>
      %34 = vector.shape_cast %33 : vector<1x1x128xf32> to vector<1x128xf32>
      %35 = vector.shape_cast %32 : vector<1x128xf32> to vector<1x1x128xf32>
      tpu.vector_store %arg6[%c0_20, %c0_21, %c0_22], %35 {strides = array<i32>} : memref<1x1x128xf32, #tpu.memory_space<vmem>>, vector<1x1x128xf32>,
    } else {
    }
    %c1_i32_3 = arith.constant 1 : i32
    %10 = arith.cmpi sge, %1, %c1_i32_3 : i32
    %c2_i32_4 = arith.constant 2 : i32
    %11 = arith.cmpi slt, %1, %c2_i32_4 : i32
    %12 = arith.andi %10, %11 : i1
    %13 = arith.extui %12 : i1 to i32
    %c0_i32_5 = arith.constant 0 : i32
    %14 = arith.cmpi ne, %13, %c0_i32_5 : i32
    scf.if %14 {
      %c0 = arith.constant 0 : index
      %c0_8 = arith.constant 0 : index
      %20 = vector.load %arg3[%c0, %c0_8] : memref<2x128xf32, #tpu.memory_space<vmem>>, vector<2x128xf32>
      %c0_9 = arith.constant 0 : index
      %c0_10 = arith.constant 0 : index
      %c0_11 = arith.constant 0 : index
      %21 = vector.load %arg5[%c0_9, %c0_10, %c0_11] : memref<1x128x128xf32, #tpu.memory_space<vmem>>, vector<1x128x128xf32>
      %22 = vector.shape_cast %21 : vector<1x128x128xf32> to vector<128x128xf32>
      %cst = arith.constant dense<0.000000e+00> : vector<128x128xf32>
      %23 = tpu.matmul %20, %20, %cst {dimension_numbers = #tpu.dot_dimension_numbers<[0], [0], [1], [1], [0, 1, 1, 1], [], []>} : vector<2x128xf32>, vector<2x128xf32>, vector<128x128xf32> -> vector<128x128xf32>
      %24 = arith.addf %22, %23 : vector<128x128xf32>
      %c0_12 = arith.constant 0 : index
      %c0_13 = arith.constant 0 : index
      %c0_14 = arith.constant 0 : index
      %25 = vector.load %arg5[%c0_12, %c0_13, %c0_14] : memref<1x128x128xf32, #tpu.memory_space<vmem>>, vector<1x128x128xf32>
      %26 = vector.shape_cast %25 : vector<1x128x128xf32> to vector<128x128xf32>
      %27 = vector.shape_cast %24 : vector<128x128xf32> to vector<1x128x128xf32>
      tpu.vector_store %arg5[%c0_12, %c0_13, %c0_14], %27 {strides = array<i32>} : memref<1x128x128xf32, #tpu.memory_space<vmem>>, vector<1x128x128xf32>,
      %cst_15 = arith.constant 1.000000e+00 : f32
      %28 = vector.broadcast %cst_15 : f32 to vector<1x2xf32>
      %c0_16 = arith.constant 0 : index
      %c0_17 = arith.constant 0 : index
      %c0_18 = arith.constant 0 : index
      %29 = vector.load %arg6[%c0_16, %c0_17, %c0_18] : memref<1x1x128xf32, #tpu.memory_space<vmem>>, vector<1x1x128xf32>
      %30 = vector.shape_cast %29 : vector<1x1x128xf32> to vector<1x128xf32>
      %cst_19 = arith.constant dense<0.000000e+00> : vector<1x128xf32>
      %31 = tpu.matmul %28, %20, %cst_19 {dimension_numbers = #tpu.dot_dimension_numbers<[1], [0], [0], [1], [0, 0, 1, 1], [], []>} : vector<1x2xf32>, vector<2x128xf32>, vector<1x128xf32> -> vector<1x128xf32>
      %32 = arith.addf %30, %31 : vector<1x128xf32>
      %c0_20 = arith.constant 0 : index
      %c0_21 = arith.constant 0 : index
      %c0_22 = arith.constant 0 : index
      %33 = vector.load %arg6[%c0_20, %c0_21, %c0_22] : memref<1x1x128xf32, #tpu.memory_space<vmem>>, vector<1x1x128xf32>
      %34 = vector.shape_cast %33 : vector<1x1x128xf32> to vector<1x128xf32>
      %35 = vector.shape_cast %32 : vector<1x128xf32> to vector<1x1x128xf32>
      tpu.vector_store %arg6[%c0_20, %c0_21, %c0_22], %35 {strides = array<i32>} : memref<1x1x128xf32, #tpu.memory_space<vmem>>, vector<1x1x128xf32>,
    } else {
    }
    %c2_i32_6 = arith.constant 2 : i32
    %15 = arith.cmpi sge, %1, %c2_i32_6 : i32
    %c3_i32 = arith.constant 3 : i32
    %16 = arith.cmpi slt, %1, %c3_i32 : i32
    %17 = arith.andi %15, %16 : i1
    %18 = arith.extui %17 : i1 to i32
    %c0_i32_7 = arith.constant 0 : i32
    %19 = arith.cmpi ne, %18, %c0_i32_7 : i32
    scf.if %19 {
      %c0 = arith.constant 0 : index
      %c0_8 = arith.constant 0 : index
      %20 = vector.load %arg4[%c0, %c0_8] : memref<5x128xf32, #tpu.memory_space<vmem>>, vector<5x128xf32>
      %c0_9 = arith.constant 0 : index
      %c0_10 = arith.constant 0 : index
      %c0_11 = arith.constant 0 : index
      %21 = vector.load %arg5[%c0_9, %c0_10, %c0_11] : memref<1x128x128xf32, #tpu.memory_space<vmem>>, vector<1x128x128xf32>
      %22 = vector.shape_cast %21 : vector<1x128x128xf32> to vector<128x128xf32>
      %cst = arith.constant dense<0.000000e+00> : vector<128x128xf32>
      %23 = tpu.matmul %20, %20, %cst {dimension_numbers = #tpu.dot_dimension_numbers<[0], [0], [1], [1], [0, 1, 1, 1], [], []>} : vector<5x128xf32>, vector<5x128xf32>, vector<128x128xf32> -> vector<128x128xf32>
      %24 = arith.addf %22, %23 : vector<128x128xf32>
      %c0_12 = arith.constant 0 : index
      %c0_13 = arith.constant 0 : index
      %c0_14 = arith.constant 0 : index
      %25 = vector.load %arg5[%c0_12, %c0_13, %c0_14] : memref<1x128x128xf32, #tpu.memory_space<vmem>>, vector<1x128x128xf32>
      %26 = vector.shape_cast %25 : vector<1x128x128xf32> to vector<128x128xf32>
      %27 = vector.shape_cast %24 : vector<128x128xf32> to vector<1x128x128xf32>
      tpu.vector_store %arg5[%c0_12, %c0_13, %c0_14], %27 {strides = array<i32>} : memref<1x128x128xf32, #tpu.memory_space<vmem>>, vector<1x128x128xf32>,
      %cst_15 = arith.constant 1.000000e+00 : f32
      %28 = vector.broadcast %cst_15 : f32 to vector<1x5xf32>
      %c0_16 = arith.constant 0 : index
      %c0_17 = arith.constant 0 : index
      %c0_18 = arith.constant 0 : index
      %29 = vector.load %arg6[%c0_16, %c0_17, %c0_18] : memref<1x1x128xf32, #tpu.memory_space<vmem>>, vector<1x1x128xf32>
      %30 = vector.shape_cast %29 : vector<1x1x128xf32> to vector<1x128xf32>
      %cst_19 = arith.constant dense<0.000000e+00> : vector<1x128xf32>
      %31 = tpu.matmul %28, %20, %cst_19 {dimension_numbers = #tpu.dot_dimension_numbers<[1], [0], [0], [1], [0, 0, 1, 1], [], []>} : vector<1x5xf32>, vector<5x128xf32>, vector<1x128xf32> -> vector<1x128xf32>
      %32 = arith.addf %30, %31 : vector<1x128xf32>
      %c0_20 = arith.constant 0 : index
      %c0_21 = arith.constant 0 : index
      %c0_22 = arith.constant 0 : index
      %33 = vector.load %arg6[%c0_20, %c0_21, %c0_22] : memref<1x1x128xf32, #tpu.memory_space<vmem>>, vector<1x1x128xf32>
      %34 = vector.shape_cast %33 : vector<1x1x128xf32> to vector<1x128xf32>
      %35 = vector.shape_cast %32 : vector<1x128xf32> to vector<1x1x128xf32>
      tpu.vector_store %arg6[%c0_20, %c0_21, %c0_22], %35 {strides = array<i32>} : memref<1x1x128xf32, #tpu.memory_space<vmem>>, vector<1x1x128xf32>,
    } else {
    }
    return
  }
  func.func @transform_0(%arg0: i32, %arg1: i32) -> (i32, i32) {
    %c2_i32 = arith.constant 2 : i32
    %0 = arith.muli %arg0, %c2_i32 : i32
    %1 = arith.addi %0, %arg1 : i32
    %c0_i32 = arith.constant 0 : i32
    %2 = arith.subi %1, %c0_i32 : i32
    %c0_i32_0 = arith.constant 0 : i32
    %c0_i32_1 = arith.constant 0 : i32
    %3 = arith.maxsi %c0_i32_0, %2 : i32
    %4 = arith.minsi %c0_i32_1, %3 : i32
    %c0_i32_2 = arith.constant 0 : i32
    %c0_i32_3 = arith.constant 0 : i32
    return %4, %c0_i32_2 : i32, i32
  }
  func.func @transform_1(%arg0: i32, %arg1: i32) -> (i32, i32) {
    %c2_i32 = arith.constant 2 : i32
    %0 = arith.muli %arg0, %c2_i32 : i32
    %1 = arith.addi %0, %arg1 : i32
    %c1_i32 = arith.constant 1 : i32
    %2 = arith.subi %1, %c1_i32 : i32
    %c0_i32 = arith.constant 0 : i32
    %c0_i32_0 = arith.constant 0 : i32
    %3 = arith.maxsi %c0_i32, %2 : i32
    %4 = arith.minsi %c0_i32_0, %3 : i32
    %c0_i32_1 = arith.constant 0 : i32
    %c0_i32_2 = arith.constant 0 : i32
    return %4, %c0_i32_1 : i32, i32
  }
  func.func @transform_2(%arg0: i32, %arg1: i32) -> (i32, i32) {
    %c2_i32 = arith.constant 2 : i32
    %0 = arith.muli %arg0, %c2_i32 : i32
    %1 = arith.addi %0, %arg1 : i32
    %c2_i32_0 = arith.constant 2 : i32
    %2 = arith.subi %1, %c2_i32_0 : i32
    %c0_i32 = arith.constant 0 : i32
    %c0_i32_1 = arith.constant 0 : i32
    %3 = arith.maxsi %c0_i32, %2 : i32
    %4 = arith.minsi %c0_i32_1, %3 : i32
    %c0_i32_2 = arith.constant 0 : i32
    %c0_i32_3 = arith.constant 0 : i32
    return %4, %c0_i32_2 : i32, i32
  }
  func.func @transform_3(%arg0: i32, %arg1: i32) -> (i32, i32, i32) {
    %c0_i32 = arith.constant 0 : i32
    %c0_i32_0 = arith.constant 0 : i32
    %c0_i32_1 = arith.constant 0 : i32
    return %arg0, %c0_i32, %c0_i32_0 : i32, i32, i32
  }
  func.func @transform_4(%arg0: i32, %arg1: i32) -> (i32, i32, i32) {
    %c0_i32 = arith.constant 0 : i32
    %c0_i32_0 = arith.constant 0 : i32
    %c0_i32_1 = arith.constant 0 : i32
    return %arg0, %c0_i32, %c0_i32_0 : i32, i32, i32
  }
}

</mosaic_0001>

<bundles_post_ra>
// kernel: tpu_custom_call.1
= control target key start
LH: loop header
LB: loop body
LE: loop exit
PB: predicated region body
PF: predicated region fallthrough
CT: control target
= control target key end

     0   :  { %s2735_s0 = inlined_call_operand.hbm [shape: f32[3,128], index: 0, kind: input, shape index: {}]   ;;  %s2736_s1 = inlined_call_operand.vmem [shape: f32[2,128], index: 1, kind: input, shape index: {}]   ;;  %s2737_s2 = inlined_call_operand.hbm [shape: f32[5,128], index: 2, kind: input, shape index: {}]   ;;  %s2738_s3 = inlined_call_operand.hbm [shape: f32[2,128,128], index: 3, kind: output, shape index: {0}]   ;;  %s2739_s4 = inlined_call_operand.hbm [shape: f32[2,1,128], index: 4, kind: output, shape index: {1}]  }
   0x1   :  { %2742 = sst [smem:[#allocation14_spill]] %s2735_s0 }
   0x2   :  { %2743 = sst [smem:[#allocation15_spill]] %s2736_s1 }
   0x3   :  { %2744 = sst [smem:[#allocation16_spill]] %s2737_s2 }
   0x4   :  { %10 = vsyncpa [#allocation3], 0 }
   0x5   :  { %12 = vsyncpa [#allocation3 + $0x1], 0 }
   0x6   :  { %13 = vsyncpa [#allocation6], 0 }
   0x7   :  { %15 = vsyncpa [#allocation6 + $0x1], 0 }
   0x8   :  { %16 = vsyncpa [#allocation4], 0 }
   0x9   :  { %18 = vsyncpa [#allocation4 + $0x1], 0 }
   0xa   :  { %19 = vsyncpa [#allocation9], 0 }
   0xb   :  { %21 = vsyncpa [#allocation9 + $0x1], 0  ;;  %s2304_s15 = smov 0   ;;  %s2306_s16 = smov 0  }
   0xc   :  { %s2308_s17 = smov 0   ;;  %s2310_s18 = smov 0  }
   0xd   :  { %s2312_s19 = smov 0   ;;  %s2314_s20 = smov 0  }
   0xe   :  { %s2316_s21 = smov 0   ;;  %s2318_s22 = smov 0  }
   0xf LB: > { %s1674_s23 = sadd.s32 4294967295, %s2261_s22   ;;  %s1675_s24 = sadd.s32 4294967294, %s2261_s22   ;;  %s2261_s22 = sphi %s2318_s22, %s27_s22   ;;  %s2257_s21 = sphi %s2316_s21, %s2763_s21   ;;  %s2253_s20 = sphi %s2314_s20, %s2762_s20   ;;  %s2249_s19 = sphi %s2312_s19, %s2761_s19   ;;  %s2245_s18 = sphi %s2310_s18, %s2760_s18   ;;  %s2241_s17 = sphi %s2308_s17, %s2759_s17   ;;  %s2237_s16 = sphi %s2306_s16, %s2758_s16   ;;  %s2233_s15 = sphi %s2304_s15, %s2757_s15  }
  0x10   : > { %s36_s25 = sadd.s32 1, %s2253_s20  ;;  %s39_s26 = sadd.s32 1, %s2257_s21 }
  0x11   : > { %p37_p0 = scmp.ge.s32.totalorder %s36_s25, 2  ;;  %p66_p1 = scmp.eq.s32.totalorder %s2261_s22, 0 }
  0x12   : > { %p2349_p2 = scmp.eq.s32.totalorder %s1674_s23, 0  ;;  %s164_s28 = sadd.s32 1, %s2241_s17 }
  0x13   : > { %s2765_s25 = smov (%p37_p0, %s36_s25), 0  ;;  %s2767_s26 = smov (!%p37_p0, %s39_s26), %s2257_s21 }
  0x14   : > { %s2745_s27 = scalar_select %p2349_p2, 1, 0 }
  0x15   : > { %p174_p3 = scmp.ne.s32.totalorder %s2241_s17, %s2237_s16  ;;  %p175_p4 = scmp.eq.s32.totalorder %s1674_s23, 3 }
  0x16   : > { %p41_p5 = scmp.ge.s32.totalorder %s2767_s26, 2  ;;  %p180_p6 = scmp.ne.s32.totalorder %s2237_s16, %s2233_s15 }
  0x17   : > { %p2361_p7 = por %p175_p4, %p174_p3  ;;  %p181_p8 = scmp.eq.s32.totalorder %s1675_s24, 3 }
  0x18   : > { %s2769_s26 = smov (%p41_p5, %s2767_s26), 0  ;;  %p1991_p10 = scmp.lt.s32.totalorder %s2261_s22, 4 }
  0x19   : > { %s2746_s29 = scalar_select %p2361_p7, 1, 0 }
  0x1a   : > { %p2367_p9 = por %p181_p8, %p180_p6  ;;  %s161_s5 = ssub.s32 %s2257_s21, %s2769_s26 }
  0x1b   : > { %p162_p11 = scmp.eq.s32.totalorder %s161_s5, 0  ;;  %s2263_s6 = smov [#allocation2]  }
  0x1c   : > { %s2747_s30 = scalar_select %p2367_p9, 1, 0 }
  0x1d   : > { %s244_s7 = sshll.u32 %s2263_s6, 4  ;;  %p2376_p12 = pnand %p1991_p10, %p66_p1  ;;  %s245_s7 = int_to_ptr.vmem [resolvable:$true] %s244_s7 }
  0x1e   : > { %s2381_s9 = scalar_select %p162_p11, %s2241_s17, %s164_s28  }
  0x1f   : > { %s2749_s0 = sld [smem:[#allocation14_spill]]  ;;  %p2073_p0 = pneg %p2376_p12 }
  0x25   : > { %s2071_s12 = scalar_lea.hbm %s2749_s0, 64 }
  0x26   : > { %p2072_p13 = scmp.ne.s32.totalorder %s2749_s0, %s2071_s12  ;;  %p2078_p4 = scmp.lt.u32.totalorder %s2071_s12, %s2749_s0 }
  0x28   : > { %p2074_p1 = pnand %p2073_p0, %p2072_p13 }
  0x2a   : > { %p2075_p3 = pneg %p2074_p1 }
  0x2c   : > { %p2080_p5 = pnand %p2078_p4, %p2075_p3 }
  0x2e   : > { %2083 = shalt.err (!%p2080_p5)
}
  0x2f   : > { %s2084_s28 = scalar_lea.vmem %s245_s7, 64  ;;  %s2091_s5 = scalar_lea.vmem %s245_s7, 128 }
  0x30   : > { %p2085_p6 = scmp.ne.s32.totalorder %s245_s7, %s2084_s28  ;;  %p2092_p11 = scmp.lt.s32.totalorder %s245_s7, %s245_s7 }
  0x31   : > { %p2093_p9 = scmp.lt.s32.totalorder %s2091_s5, %s2084_s28 }
  0x32   : > { %p2087_p8 = pnand %p2085_p6, %p2073_p0 }
  0x33   : > { %p2094_p7 = por %p2093_p9, %p2092_p11 }
  0x34   : > { %p2088_p10 = pneg %p2087_p8 }
  0x36   : > { %p2095_p2 = pnand %p2094_p7, %p2088_p10 }
  0x38   : > { %2098 = shalt.err (!%p2095_p2)
}
  0x39   : > { %1980 = dma.hbm_to_vmem [thread:$0]  (!%p2376_p12), %s2749_s0, 64, %s245_s7, [#allocation3]  }
  0x3a   : > { %p1735_p13 = scmp.ge.s32.totalorder %s2261_s22, 1  ;;  %p295_p1 = scmp.lt.s32.totalorder %s2261_s22, 5 }
  0x3b   : > { %s2264_s12 = smov [#allocation5]   ;;  %s2751_s2 = sld [smem:[#allocation16_spill]] }
  0x3c   : > { %p2407_p3 = pnand %p1735_p13, %p295_p1  ;;  %s290_s13 = sshll.u32 %s2264_s12, 4  ;;  %s291_s13 = int_to_ptr.vmem [resolvable:$true] %s290_s13 }
  0x3e   : > { %s2750_s11 = scalar_select %p2407_p3, 1, 0 }
  0x41   : > { %s2099_s24 = scalar_lea.hbm %s2751_s2, 128 }
  0x42   : > { %p2100_p2 = scmp.ne.s32.totalorder %s2751_s2, %s2099_s24  ;;  %p2106_p4 = scmp.lt.u32.totalorder %s2099_s24, %s2751_s2 }
  0x44   : > { %p2102_p7 = pnand %p2100_p2, %p2073_p0 }
  0x46   : > { %p2103_p9 = pneg %p2102_p7 }
  0x48   : > { %p2108_p5 = pnand %p2106_p4, %p2103_p9 }
  0x4a   : > { %2111 = shalt.err (!%p2108_p5)
}
  0x4b   : > { %s2112_s10 = scalar_lea.vmem %s291_s13, 128  ;;  %s2119_s12 = scalar_lea.vmem %s291_s13, 256 }
  0x4c   : > { %p2113_p6 = scmp.ne.s32.totalorder %s291_s13, %s2112_s10  ;;  %p2120_p11 = scmp.lt.s32.totalorder %s291_s13, %s291_s13 }
  0x4d   : > { %p2121_p13 = scmp.lt.s32.totalorder %s2119_s12, %s2112_s10 }
  0x4e   : > { %p2115_p8 = pnand %p2113_p6, %p2073_p0 }
  0x4f   : > { %p2122_p1 = por %p2121_p13, %p2120_p11 }
  0x50   : > { %p2116_p10 = pneg %p2115_p8 }
  0x52   : > { %p2123_p3 = pnand %p2122_p1, %p2116_p10 }
  0x54   : > { %2126 = shalt.err (!%p2123_p3)
}
  0x55   : > { %1983 = dma.hbm_to_vmem [thread:$0]  (!%p2376_p12), %s2751_s2, 128, %s291_s13, [#allocation6]  }
  0x56   : > { %p2752_p2 = scmp.ne.s32.totalorder %s2750_s11, 0 }
  0x57   : > { %p2753_p7 = scmp.ne.s32.totalorder (!%p2752_p2), %s2745_s27, 0 }
  0x58   : > { %299 = sbr.rel (%p2752_p2) target bundleno = 1404 (0x57c), region = 32 }
  0x5f   : > { %2216 = dma.done.wait (%p2753_p7), [#allocation3], 64  }
  0x60   : > { %2218 = vsyncadd (%p2753_p7), [#allocation3], 4294967232 }
  0x61   : > { %2220 = dma.done.wait (%p2753_p7), [#allocation6], 128  }
  0x62   : > { %2222 = vsyncadd (%p2753_p7), [#allocation6], 4294967168  ;;  %s2442_s8 = sand.u32 1, %s2237_s16   ;;  %s1747_s11 = sshll.u32 %s2249_s19, 1 }
  0x63   : > { %s1738_s13 = sshll.u32 %s2442_s8, 7  ;;  %s2447_s24 = sadd.s32 %s2245_s18, %s1747_s11 }
  0x64   : > { %s2449_s28 = scalar_lea.vmem [#allocation7], %s1738_s13  ;;  %s2452_s5 = scalar_lea.vmem [#allocation8], %s2442_s8 }
  0x65   : > { %p1748_p12 = scmp.ne.s32.totalorder %s2245_s18, 0 }
  0x66   : > { %v2265_v0 = vmov (!%p1748_p12), 0.0  }
  0x67   : > { %395 = sbr.rel (%p1748_p12) target bundleno = 112 (0x70), region = 44  ;;  %396 = vst [vmem:[%s2449_s28] sm:$0xff] (!%p1748_p12), %v2265_v0  ;;  %397 = vst [vmem:[%s2449_s28 + $0x8] sm:$0xff] (!%p1748_p12), %v2265_v0 }
  0x68   : > { %398 = vst [vmem:[%s2449_s28 + $0x10] sm:$0xff] (!%p1748_p12), %v2265_v0  ;;  %399 = vst [vmem:[%s2449_s28 + $0x18] sm:$0xff] (!%p1748_p12), %v2265_v0 }
  0x69   : > { %400 = vst [vmem:[%s2449_s28 + $0x20] sm:$0xff] (!%p1748_p12), %v2265_v0  ;;  %401 = vst [vmem:[%s2449_s28 + $0x28] sm:$0xff] (!%p1748_p12), %v2265_v0 }
  0x6a   : > { %402 = vst [vmem:[%s2449_s28 + $0x30] sm:$0xff] (!%p1748_p12), %v2265_v0  ;;  %403 = vst [vmem:[%s2449_s28 + $0x38] sm:$0xff] (!%p1748_p12), %v2265_v0 }
  0x6b   : > { %404 = vst [vmem:[%s2449_s28 + $0x40] sm:$0xff] (!%p1748_p12), %v2265_v0  ;;  %405 = vst [vmem:[%s2449_s28 + $0x48] sm:$0xff] (!%p1748_p12), %v2265_v0 }
  0x6c   : > { %406 = vst [vmem:[%s2449_s28 + $0x50] sm:$0xff] (!%p1748_p12), %v2265_v0  ;;  %407 = vst [vmem:[%s2449_s28 + $0x58] sm:$0xff] (!%p1748_p12), %v2265_v0 }
  0x6d   : > { %408 = vst [vmem:[%s2449_s28 + $0x60] sm:$0xff] (!%p1748_p12), %v2265_v0  ;;  %409 = vst [vmem:[%s2449_s28 + $0x68] sm:$0xff] (!%p1748_p12), %v2265_v0 }
  0x6e   : > { %410 = vst [vmem:[%s2449_s28 + $0x70] sm:$0xff] %v2265_v0  ;;  %411 = vst [vmem:[%s2449_s28 + $0x78] sm:$0xff] %v2265_v0 }
  0x6f   : > { %412 = vst [vmem:[%s2452_s5] sm:$0x1] %v2265_v0 }
  0x70 PF: > { %p413_p0 = scmp.ge.s32.totalorder %s2447_s24, 0  ;;  %p414_p3 = scmp.lt.s32.totalorder %s2447_s24, 1 }
  0x72   : > { %p415_p9 = pnand %p414_p3, %p413_p0 }
  0x73   : > { %v419_v1 = vld [vmem:[#allocation2] sm:$0x7] (!%p415_p9)  ;;  %vm517_vm0 = vcmask (!%p415_p9), 1042432   ;;  %v2266_v2 = vmov (!%p415_p9), 0.0   ;;  %vm468_vm1 = vcmask (!%p415_p9), 23552   ;;  %vm2267_vm2 = vmmov (!%p415_p9), 0  }
  0x74   : > { %418 = sbr.rel (%p415_p9) target bundleno = 524 (0x20c), region = 48  ;;  %436 = vxpose.xlu0.b32.start.end [1/1] (short) (!%p415_p9), %v419_v1, 128  ;;  %1870 = vmatprep.subr.msk.mxu0 (!%p415_p9), %vm517_vm0, %v419_v1  ;;  %v2268_v19 = vmov (!%p415_p9), 1.0   ;;  %v421_v20 = vld [vmem:[%s2449_s28 + $0x8] sm:$0xff] (!%p415_p9)  ;;  %v420_v21 = vld [vmem:[%s2449_s28] sm:$0xff] (!%p415_p9)  ;;  %v423_v26 = vld [vmem:[%s2449_s28 + $0x18] sm:$0xff] (!%p415_p9) }
  0x75   : > { %1963 = vmatprep.subr.msk.mxu1 (!%p415_p9), %vm517_vm0, %v419_v1  ;;  %1871 = vmatpush3.msk.msra.mxu0 (!%p415_p9), %vm517_vm0, %v419_v1  ;;  %v422_v27 = vld [vmem:[%s2449_s28 + $0x10] sm:$0xff] (!%p415_p9)  ;;  %v425_v32 = vld [vmem:[%s2449_s28 + $0x28] sm:$0xff] (!%p415_p9)  ;;  %v424_v33 = vld [vmem:[%s2449_s28 + $0x20] sm:$0xff] (!%p415_p9) }
  0x76   : > { %1964 = vmatpush3.msk.msra.mxu1 (!%p415_p9), %vm517_vm0, %v419_v1  ;;  %v427_v38 = vld [vmem:[%s2449_s28 + $0x38] sm:$0xff] (!%p415_p9)  ;;  %v426_v39 = vld [vmem:[%s2449_s28 + $0x30] sm:$0xff] (!%p415_p9)  ;;  %v429_v44 = vld [vmem:[%s2449_s28 + $0x48] sm:$0xff] (!%p415_p9) }
  0x77   : > { %1896 = vmatprep.subr.mxu1 (!%p415_p9), %v2266_v2  ;;  %v428_v45 = vld [vmem:[%s2449_s28 + $0x40] sm:$0xff] (!%p415_p9)  ;;  %v431_v50 = vld [vmem:[%s2449_s28 + $0x58] sm:$0xff] (!%p415_p9)  ;;  %v430_v51 = vld [vmem:[%s2449_s28 + $0x50] sm:$0xff] (!%p415_p9) }
  0x78   : > { %v433_v56 = vld [vmem:[%s2449_s28 + $0x68] sm:$0xff] (!%p415_p9)  ;;  %v432_v57 = vld [vmem:[%s2449_s28 + $0x60] sm:$0xff] (!%p415_p9)  ;;  %v435_v62 = vld [vmem:[%s2449_s28 + $0x78] sm:$0xff] (!%p415_p9) }
  0x79   : > { %v434_v63 = vld [vmem:[%s2449_s28 + $0x70] sm:$0xff] (!%p415_p9) }
  0xf4   : > { %v452_v3 = vpop.trf.xlu0 }
  0xf5   : > { %1872 = vmatprep.mubr.msk.f32.mxu0 %vm468_vm1, %v452_v3 }
  0xf8   : > { %v453_v4 = vpop.trf.xlu0 }
  0xf9   : > { %1873 = vmatmul.mubr.msk.f32.vlgmr.msra.gmra.mrb[0].mxu0 %vm468_vm1, %v453_v4  ;;  %v698_v4 = vld [vmem:[%s2452_s5] sm:$0x1] }
  0xfc   : > { %v454_v5 = vpop.trf.xlu0 }
  0xfd   : > { %1875 = vmatprep.mubr.msk.f32.mxu0 %vm468_vm1, %v454_v5 }
 0x100   : > { %v455_v6 = vpop.trf.xlu0 }
 0x101   : > { %1876 = vmatmul.mubr.msk.f32.gmra.mrb[2].mxu0 %vm468_vm1, %v455_v6 }
 0x104   : > { %v456_v7 = vpop.trf.xlu0 }
 0x105   : > { %1878 = vmatprep.mubr.msk.f32.mxu0 %vm468_vm1, %v456_v7 }
 0x108   : > { %v457_v8 = vpop.trf.xlu0 }
 0x109   : > { %1879 = vmatmul.mubr.msk.f32.gmra.mrb[4].mxu0 %vm468_vm1, %v457_v8 }
 0x10c   : > { %v458_v9 = vpop.trf.xlu0 }
 0x10d   : > { %1881 = vmatprep.mubr.msk.f32.mxu0 %vm468_vm1, %v458_v9 }
 0x110   : > { %v459_v10 = vpop.trf.xlu0 }
 0x111   : > { %1882 = vmatmul.mubr.msk.f32.gmra.mrb[6].mxu0 %vm468_vm1, %v459_v10 }
 0x114   : > { %v460_v11 = vpop.trf.xlu0 }
 0x115   : > { %1884 = vmatprep.mubr.msk.f32.mxu0 %vm468_vm1, %v460_v11 }
 0x118   : > { %v461_v12 = vpop.trf.xlu0 }
 0x119   : > { %1885 = vmatmul.mubr.msk.f32.gmra.mrb[8].mxu0 %vm468_vm1, %v461_v12 }
 0x11c   : > { %v462_v13 = vpop.trf.xlu0 }
 0x11d   : > { %1887 = vmatprep.mubr.msk.f32.mxu1 %vm468_vm1, %v462_v13 }
 0x120   : > { %v463_v14 = vpop.trf.xlu0 }
 0x121   : > { %1888 = vmatmul.mubr.msk.f32.vlgmr.msra.gmra.mrb[0].mxu1 %vm468_vm1, %v463_v14 }
 0x122   : > { %1897 = vmatpush3.msk.msra.mxu1 %vm517_vm0, %v419_v1 }
 0x124   : > { %v464_v15 = vpop.trf.xlu0 }
 0x125   : > { %1890 = vmatprep.mubr.msk.f32.mxu1 %vm468_vm1, %v464_v15 }
 0x128   : > { %v465_v16 = vpop.trf.xlu0 }
 0x129   : > { %1891 = vmatmul.mubr.msk.f32.gmra.mrb[2].mxu1 %vm468_vm1, %v465_v16 }
 0x12c   : > { %v466_v17 = vpop.trf.xlu0 }
 0x12d   : > { %1893 = vmatprep.mubr.msk.f32.mxu1 %vm468_vm1, %v466_v17 }
 0x130   : > { %v467_v18 = vpop.trf.xlu0 }
 0x131   : > { %1894 = vmatmul.mubr.msk.f32.gmra.mrb[4].mxu1 %vm468_vm1, %v467_v18 }
 0x132   : > { %1898 = vmatprep.mubr.msk.f32.mxu1 %vm2267_vm2, %v2266_v2 }
 0x135   : > { %1899 = vmatmul.mubr.msk.f32.vlgmr.msra.gmra.mrb[6].mxu1 %vm468_vm1, %v2268_v19 }
 0x1cc   : > { %v1874_v22 = vpop.f32.mrb[0].mxu0 }
 0x1cd   : > { %v667_v23 = vadd.f32 %v1874_v22, %v421_v20  ;;  %v587_v24 = vpop.f32.mrb[1].mxu0 }
 0x1ce   : > { %v666_v25 = vadd.f32 %v587_v24, %v420_v21 }
 0x1cf   : > { %683 = vst [vmem:[%s2449_s28 + $0x8] sm:$0xff] %v667_v23 }
 0x1d0   : > { %682 = vst [vmem:[%s2449_s28] sm:$0xff] %v666_v25 }
 0x1d4   : > { %v1877_v28 = vpop.f32.mrb[2].mxu0 }
 0x1d5   : > { %v669_v29 = vadd.f32 %v1877_v28, %v423_v26  ;;  %v597_v30 = vpop.f32.mrb[3].mxu0 }
 0x1d6   : > { %v668_v31 = vadd.f32 %v597_v30, %v422_v27 }
 0x1d7   : > { %685 = vst [vmem:[%s2449_s28 + $0x18] sm:$0xff] %v669_v29 }
 0x1d8   : > { %684 = vst [vmem:[%s2449_s28 + $0x10] sm:$0xff] %v668_v31 }
 0x1dc   : > { %v1880_v34 = vpop.f32.mrb[4].mxu0 }
 0x1dd   : > { %v671_v35 = vadd.f32 %v1880_v34, %v425_v32  ;;  %v607_v36 = vpop.f32.mrb[5].mxu0 }
 0x1de   : > { %v670_v37 = vadd.f32 %v607_v36, %v424_v33 }
 0x1df   : > { %687 = vst [vmem:[%s2449_s28 + $0x28] sm:$0xff] %v671_v35 }
 0x1e0   : > { %686 = vst [vmem:[%s2449_s28 + $0x20] sm:$0xff] %v670_v37 }
 0x1e4   : > { %v1883_v40 = vpop.f32.mrb[6].mxu0 }
 0x1e5   : > { %v673_v41 = vadd.f32 %v1883_v40, %v427_v38  ;;  %v617_v42 = vpop.f32.mrb[7].mxu0 }
 0x1e6   : > { %v672_v43 = vadd.f32 %v617_v42, %v426_v39 }
 0x1e7   : > { %689 = vst [vmem:[%s2449_s28 + $0x38] sm:$0xff] %v673_v41 }
 0x1e8   : > { %688 = vst [vmem:[%s2449_s28 + $0x30] sm:$0xff] %v672_v43 }
 0x1ec   : > { %v1886_v46 = vpop.f32.mrb[8].mxu0 }
 0x1ed   : > { %v675_v47 = vadd.f32 %v1886_v46, %v429_v44  ;;  %v627_v48 = vpop.f32.mrb[9].mxu0 }
 0x1ee   : > { %v674_v49 = vadd.f32 %v627_v48, %v428_v45 }
 0x1ef   : > { %691 = vst [vmem:[%s2449_s28 + $0x48] sm:$0xff] %v675_v47 }
 0x1f0   : > { %690 = vst [vmem:[%s2449_s28 + $0x40] sm:$0xff] %v674_v49 }
 0x1f4   : > { %v1889_v52 = vpop.f32.mrb[0].mxu1 }
 0x1f5   : > { %v677_v53 = vadd.f32 %v1889_v52, %v431_v50  ;;  %v637_v54 = vpop.f32.mrb[1].mxu1 }
 0x1f6   : > { %v676_v55 = vadd.f32 %v637_v54, %v430_v51 }
 0x1f7   : > { %693 = vst [vmem:[%s2449_s28 + $0x58] sm:$0xff] %v677_v53 }
 0x1f8   : > { %692 = vst [vmem:[%s2449_s28 + $0x50] sm:$0xff] %v676_v55 }
 0x1fc   : > { %v1892_v58 = vpop.f32.mrb[2].mxu1 }
 0x1fd   : > { %v679_v59 = vadd.f32 %v1892_v58, %v433_v56  ;;  %v647_v60 = vpop.f32.mrb[3].mxu1 }
 0x1fe   : > { %v678_v61 = vadd.f32 %v647_v60, %v432_v57 }
 0x1ff   : > { %695 = vst [vmem:[%s2449_s28 + $0x68] sm:$0xff] %v679_v59 }
 0x200   : > { %694 = vst [vmem:[%s2449_s28 + $0x60] sm:$0xff] %v678_v61 }
 0x204   : > { %v1895_v0 = vpop.f32.mrb[4].mxu1 }
 0x205   : > { %v681_v1 = vadd.f32 %v1895_v0, %v435_v62  ;;  %v657_v2 = vpop.f32.mrb[5].mxu1 }
 0x206   : > { %v680_v3 = vadd.f32 %v657_v2, %v434_v63 }
 0x207   : > { %697 = vst [vmem:[%s2449_s28 + $0x78] sm:$0xff] %v681_v1 }
 0x208   : > { %696 = vst [vmem:[%s2449_s28 + $0x70] sm:$0xff] %v680_v3  ;;  %v768_v5 = vpop.f32.mrb[6].mxu1 }
 0x209   : > { %v772_v6 = vadd.f32 %v768_v5, %v698_v4  ;;  %v1900_v7 = vpop.f32.mrb[7].mxu1 }
 0x20b   : > { %773 = vst [vmem:[%s2452_s5] sm:$0x1] %v772_v6 }
 0x20c PF: > { %p774_p4 = scmp.ge.s32.totalorder %s2447_s24, 1  ;;  %p775_p5 = scmp.lt.s32.totalorder %s2447_s24, 2 }
 0x20e   : > { %p776_p6 = pnand %p775_p5, %p774_p4 }
 0x20f   : > { %s2754_s1 = sld [smem:[#allocation15_spill]] (!%p776_p6)  ;;  %vm878_vm3 = vcmask (!%p776_p6), 1041408   ;;  %v2269_v9 = vmov (!%p776_p6), 0.0   ;;  %vm829_vm4 = vcmask (!%p776_p6), 15360   ;;  %vm2270_vm5 = vmmov (!%p776_p6), 0   ;;  %v782_v27 = vld [vmem:[%s2449_s28 + $0x8] sm:$0xff] (!%p776_p6) }
 0x210   : > { %779 = sbr.rel (%p776_p6) target bundleno = 942 (0x3ae), region = 52  ;;  %v2271_v26 = vmov (!%p776_p6), 1.0   ;;  %v781_v28 = vld [vmem:[%s2449_s28] sm:$0xff] (!%p776_p6)  ;;  %v784_v33 = vld [vmem:[%s2449_s28 + $0x18] sm:$0xff] (!%p776_p6)  ;;  %v783_v34 = vld [vmem:[%s2449_s28 + $0x10] sm:$0xff] (!%p776_p6) }
 0x211   : > { %v786_v39 = vld [vmem:[%s2449_s28 + $0x28] sm:$0xff] (!%p776_p6)  ;;  %v785_v40 = vld [vmem:[%s2449_s28 + $0x20] sm:$0xff] (!%p776_p6)  ;;  %v788_v45 = vld [vmem:[%s2449_s28 + $0x38] sm:$0xff] (!%p776_p6) }
 0x212   : > { %v787_v46 = vld [vmem:[%s2449_s28 + $0x30] sm:$0xff] (!%p776_p6)  ;;  %v790_v51 = vld [vmem:[%s2449_s28 + $0x48] sm:$0xff] (!%p776_p6)  ;;  %v789_v52 = vld [vmem:[%s2449_s28 + $0x40] sm:$0xff] (!%p776_p6) }
 0x213   : > { %v792_v57 = vld [vmem:[%s2449_s28 + $0x58] sm:$0xff] (!%p776_p6)  ;;  %v791_v58 = vld [vmem:[%s2449_s28 + $0x50] sm:$0xff] (!%p776_p6)  ;;  %v794_v63 = vld [vmem:[%s2449_s28 + $0x68] sm:$0xff] (!%p776_p6) }
 0x214   : > { %v793_v0 = vld [vmem:[%s2449_s28 + $0x60] sm:$0xff] (!%p776_p6)  ;;  %v796_v5 = vld [vmem:[%s2449_s28 + $0x78] sm:$0xff] (!%p776_p6)  ;;  %v795_v6 = vld [vmem:[%s2449_s28 + $0x70] sm:$0xff] (!%p776_p6) }
 0x215   : > { %v780_v8 = vld [vmem:[%s2754_s1] sm:$0x3] (!%p776_p6) }
 0x216   : > { %797 = vxpose.xlu0.b32.start.end [1/1] (short) (!%p776_p6), %v780_v8, 128  ;;  %1901 = vmatprep.subr.msk.mxu0 (!%p776_p6), %vm878_vm3, %v780_v8 }
 0x217   : > { %1965 = vmatprep.subr.msk.mxu1 %vm878_vm3, %v780_v8  ;;  %1902 = vmatpush3.msk.msra.mxu0 %vm878_vm3, %v780_v8 }
 0x218   : > { %1966 = vmatpush3.msk.msra.mxu1 %vm878_vm3, %v780_v8 }
 0x219   : > { %1927 = vmatprep.subr.mxu1 %v2269_v9 }
 0x296   : > { %v813_v10 = vpop.trf.xlu0 }
 0x297   : > { %1903 = vmatprep.mubr.msk.f32.mxu0 %vm829_vm4, %v813_v10 }
 0x29a   : > { %v814_v11 = vpop.trf.xlu0 }
 0x29b   : > { %1904 = vmatmul.mubr.msk.f32.vlgmr.msra.gmra.mrb[0].mxu0 %vm829_vm4, %v814_v11  ;;  %v1059_v11 = vld [vmem:[%s2452_s5] sm:$0x1] }
 0x29e   : > { %v815_v12 = vpop.trf.xlu0 }
 0x29f   : > { %1906 = vmatprep.mubr.msk.f32.mxu0 %vm829_vm4, %v815_v12 }
 0x2a2   : > { %v816_v13 = vpop.trf.xlu0 }
 0x2a3   : > { %1907 = vmatmul.mubr.msk.f32.gmra.mrb[2].mxu0 %vm829_vm4, %v816_v13 }
 0x2a6   : > { %v817_v14 = vpop.trf.xlu0 }
 0x2a7   : > { %1909 = vmatprep.mubr.msk.f32.mxu0 %vm829_vm4, %v817_v14 }
 0x2aa   : > { %v818_v15 = vpop.trf.xlu0 }
 0x2ab   : > { %1910 = vmatmul.mubr.msk.f32.gmra.mrb[4].mxu0 %vm829_vm4, %v818_v15 }
 0x2ae   : > { %v819_v16 = vpop.trf.xlu0 }
 0x2af   : > { %1912 = vmatprep.mubr.msk.f32.mxu0 %vm829_vm4, %v819_v16 }
 0x2b2   : > { %v820_v17 = vpop.trf.xlu0 }
 0x2b3   : > { %1913 = vmatmul.mubr.msk.f32.gmra.mrb[6].mxu0 %vm829_vm4, %v820_v17 }
 0x2b6   : > { %v821_v18 = vpop.trf.xlu0 }
 0x2b7   : > { %1915 = vmatprep.mubr.msk.f32.mxu0 %vm829_vm4, %v821_v18 }
 0x2ba   : > { %v822_v19 = vpop.trf.xlu0 }
 0x2bb   : > { %1916 = vmatmul.mubr.msk.f32.gmra.mrb[8].mxu0 %vm829_vm4, %v822_v19 }
 0x2be   : > { %v823_v20 = vpop.trf.xlu0 }
 0x2bf   : > { %1918 = vmatprep.mubr.msk.f32.mxu1 %vm829_vm4, %v823_v20 }
 0x2c2   : > { %v824_v21 = vpop.trf.xlu0 }
 0x2c3   : > { %1919 = vmatmul.mubr.msk.f32.vlgmr.msra.gmra.mrb[0].mxu1 %vm829_vm4, %v824_v21 }
 0x2c4   : > { %1928 = vmatpush3.msk.msra.mxu1 %vm878_vm3, %v780_v8 }
 0x2c6   : > { %v825_v22 = vpop.trf.xlu0 }
 0x2c7   : > { %1921 = vmatprep.mubr.msk.f32.mxu1 %vm829_vm4, %v825_v22 }
 0x2ca   : > { %v826_v23 = vpop.trf.xlu0 }
 0x2cb   : > { %1922 = vmatmul.mubr.msk.f32.gmra.mrb[2].mxu1 %vm829_vm4, %v826_v23 }
 0x2ce   : > { %v827_v24 = vpop.trf.xlu0 }
 0x2cf   : > { %1924 = vmatprep.mubr.msk.f32.mxu1 %vm829_vm4, %v827_v24 }
 0x2d2   : > { %v828_v25 = vpop.trf.xlu0 }
 0x2d3   : > { %1925 = vmatmul.mubr.msk.f32.gmra.mrb[4].mxu1 %vm829_vm4, %v828_v25 }
 0x2d4   : > { %1929 = vmatprep.mubr.msk.f32.mxu1 %vm2270_vm5, %v2269_v9 }
 0x2d7   : > { %1930 = vmatmul.mubr.msk.f32.vlgmr.msra.gmra.mrb[6].mxu1 %vm829_vm4, %v2271_v26 }
 0x36e   : > { %v1905_v29 = vpop.f32.mrb[0].mxu0 }
 0x36f   : > { %v1028_v30 = vadd.f32 %v1905_v29, %v782_v27  ;;  %v948_v31 = vpop.f32.mrb[1].mxu0 }
 0x370   : > { %v1027_v32 = vadd.f32 %v948_v31, %v781_v28 }
 0x371   : > { %1044 = vst [vmem:[%s2449_s28 + $0x8] sm:$0xff] %v1028_v30 }
 0x372   : > { %1043 = vst [vmem:[%s2449_s28] sm:$0xff] %v1027_v32 }
 0x376   : > { %v1908_v35 = vpop.f32.mrb[2].mxu0 }
 0x377   : > { %v1030_v36 = vadd.f32 %v1908_v35, %v784_v33  ;;  %v958_v37 = vpop.f32.mrb[3].mxu0 }
 0x378   : > { %v1029_v38 = vadd.f32 %v958_v37, %v783_v34 }
 0x379   : > { %1046 = vst [vmem:[%s2449_s28 + $0x18] sm:$0xff] %v1030_v36 }
 0x37a   : > { %1045 = vst [vmem:[%s2449_s28 + $0x10] sm:$0xff] %v1029_v38 }
 0x37e   : > { %v1911_v41 = vpop.f32.mrb[4].mxu0 }
 0x37f   : > { %v1032_v42 = vadd.f32 %v1911_v41, %v786_v39  ;;  %v968_v43 = vpop.f32.mrb[5].mxu0 }
 0x380   : > { %v1031_v44 = vadd.f32 %v968_v43, %v785_v40 }
 0x381   : > { %1048 = vst [vmem:[%s2449_s28 + $0x28] sm:$0xff] %v1032_v42 }
 0x382   : > { %1047 = vst [vmem:[%s2449_s28 + $0x20] sm:$0xff] %v1031_v44 }
 0x386   : > { %v1914_v47 = vpop.f32.mrb[6].mxu0 }
 0x387   : > { %v1034_v48 = vadd.f32 %v1914_v47, %v788_v45  ;;  %v978_v49 = vpop.f32.mrb[7].mxu0 }
 0x388   : > { %v1033_v50 = vadd.f32 %v978_v49, %v787_v46 }
 0x389   : > { %1050 = vst [vmem:[%s2449_s28 + $0x38] sm:$0xff] %v1034_v48 }
 0x38a   : > { %1049 = vst [vmem:[%s2449_s28 + $0x30] sm:$0xff] %v1033_v50 }
 0x38e   : > { %v1917_v53 = vpop.f32.mrb[8].mxu0 }
 0x38f   : > { %v1036_v54 = vadd.f32 %v1917_v53, %v790_v51  ;;  %v988_v55 = vpop.f32.mrb[9].mxu0 }
 0x390   : > { %v1035_v56 = vadd.f32 %v988_v55, %v789_v52 }
 0x391   : > { %1052 = vst [vmem:[%s2449_s28 + $0x48] sm:$0xff] %v1036_v54 }
 0x392   : > { %1051 = vst [vmem:[%s2449_s28 + $0x40] sm:$0xff] %v1035_v56 }
 0x396   : > { %v1920_v59 = vpop.f32.mrb[0].mxu1 }
 0x397   : > { %v1038_v60 = vadd.f32 %v1920_v59, %v792_v57  ;;  %v998_v61 = vpop.f32.mrb[1].mxu1 }
 0x398   : > { %v1037_v62 = vadd.f32 %v998_v61, %v791_v58 }
 0x399   : > { %1054 = vst [vmem:[%s2449_s28 + $0x58] sm:$0xff] %v1038_v60 }
 0x39a   : > { %1053 = vst [vmem:[%s2449_s28 + $0x50] sm:$0xff] %v1037_v62 }
 0x39e   : > { %v1923_v1 = vpop.f32.mrb[2].mxu1 }
 0x39f   : > { %v1040_v2 = vadd.f32 %v1923_v1, %v794_v63  ;;  %v1008_v3 = vpop.f32.mrb[3].mxu1 }
 0x3a0   : > { %v1039_v4 = vadd.f32 %v1008_v3, %v793_v0 }
 0x3a1   : > { %1056 = vst [vmem:[%s2449_s28 + $0x68] sm:$0xff] %v1040_v2 }
 0x3a2   : > { %1055 = vst [vmem:[%s2449_s28 + $0x60] sm:$0xff] %v1039_v4 }
 0x3a6   : > { %v1926_v7 = vpop.f32.mrb[4].mxu1 }
 0x3a7   : > { %v1042_v8 = vadd.f32 %v1926_v7, %v796_v5  ;;  %v1018_v9 = vpop.f32.mrb[5].mxu1 }
 0x3a8   : > { %v1041_v10 = vadd.f32 %v1018_v9, %v795_v6 }
 0x3a9   : > { %1058 = vst [vmem:[%s2449_s28 + $0x78] sm:$0xff] %v1042_v8 }
 0x3aa   : > { %1057 = vst [vmem:[%s2449_s28 + $0x70] sm:$0xff] %v1041_v10  ;;  %v1129_v12 = vpop.f32.mrb[6].mxu1 }
 0x3ab   : > { %v1133_v13 = vadd.f32 %v1129_v12, %v1059_v11  ;;  %v1931_v14 = vpop.f32.mrb[7].mxu1 }
 0x3ad   : > { %1134 = vst [vmem:[%s2452_s5] sm:$0x1] %v1133_v13 }
 0x3ae PF: > { %p1135_p8 = scmp.ge.s32.totalorder %s2447_s24, 2  ;;  %p1136_p10 = scmp.lt.s32.totalorder %s2447_s24, 3 }
 0x3b0   : > { %p1137_p11 = pnand %p1136_p10, %p1135_p8 }
 0x3b1   : > { %v1141_v15 = vld [vmem:[#allocation5] sm:$0x1f] (!%p1137_p11)  ;;  %vm1239_vm6 = vcmask (!%p1137_p11), 1044480   ;;  %v2272_v16 = vmov (!%p1137_p11), 0.0   ;;  %vm1190_vm7 = vcmask (!%p1137_p11), 39936   ;;  %vm2273_vm8 = vmmov (!%p1137_p11), 0  }
 0x3b2   : > { %1140 = sbr.rel (%p1137_p11) target bundleno = 1354 (0x54a), region = 56  ;;  %1158 = vxpose.xlu0.b32.start.end [1/1] (short) (!%p1137_p11), %v1141_v15, 128  ;;  %1932 = vmatprep.subr.msk.mxu0 (!%p1137_p11), %vm1239_vm6, %v1141_v15  ;;  %v2274_v33 = vmov (!%p1137_p11), 1.0   ;;  %v1143_v34 = vld [vmem:[%s2449_s28 + $0x8] sm:$0xff] (!%p1137_p11)  ;;  %v1142_v35 = vld [vmem:[%s2449_s28] sm:$0xff] (!%p1137_p11)  ;;  %v1145_v40 = vld [vmem:[%s2449_s28 + $0x18] sm:$0xff] (!%p1137_p11) }
 0x3b3   : > { %1967 = vmatprep.subr.msk.mxu1 (!%p1137_p11), %vm1239_vm6, %v1141_v15  ;;  %1933 = vmatpush3.msk.msra.mxu0 (!%p1137_p11), %vm1239_vm6, %v1141_v15  ;;  %v1144_v41 = vld [vmem:[%s2449_s28 + $0x10] sm:$0xff] (!%p1137_p11)  ;;  %v1147_v46 = vld [vmem:[%s2449_s28 + $0x28] sm:$0xff] (!%p1137_p11)  ;;  %v1146_v47 = vld [vmem:[%s2449_s28 + $0x20] sm:$0xff] (!%p1137_p11) }
 0x3b4   : > { %1968 = vmatpush3.msk.msra.mxu1 (!%p1137_p11), %vm1239_vm6, %v1141_v15  ;;  %v1149_v52 = vld [vmem:[%s2449_s28 + $0x38] sm:$0xff] (!%p1137_p11)  ;;  %v1148_v53 = vld [vmem:[%s2449_s28 + $0x30] sm:$0xff] (!%p1137_p11)  ;;  %v1151_v58 = vld [vmem:[%s2449_s28 + $0x48] sm:$0xff] (!%p1137_p11) }
 0x3b5   : > { %1958 = vmatprep.subr.mxu1 (!%p1137_p11), %v2272_v16  ;;  %v1150_v59 = vld [vmem:[%s2449_s28 + $0x40] sm:$0xff] (!%p1137_p11)  ;;  %v1153_v0 = vld [vmem:[%s2449_s28 + $0x58] sm:$0xff] (!%p1137_p11)  ;;  %v1152_v1 = vld [vmem:[%s2449_s28 + $0x50] sm:$0xff] (!%p1137_p11) }
 0x3b6   : > { %v1155_v6 = vld [vmem:[%s2449_s28 + $0x68] sm:$0xff] (!%p1137_p11)  ;;  %v1154_v7 = vld [vmem:[%s2449_s28 + $0x60] sm:$0xff] (!%p1137_p11)  ;;  %v1157_v12 = vld [vmem:[%s2449_s28 + $0x78] sm:$0xff] (!%p1137_p11) }
 0x3b7   : > { %v1156_v13 = vld [vmem:[%s2449_s28 + $0x70] sm:$0xff] (!%p1137_p11) }
 0x432   : > { %v1174_v17 = vpop.trf.xlu0 }
 0x433   : > { %1934 = vmatprep.mubr.msk.f32.mxu0 %vm1190_vm7, %v1174_v17 }
 0x436   : > { %v1175_v18 = vpop.trf.xlu0 }
 0x437   : > { %1935 = vmatmul.mubr.msk.f32.vlgmr.msra.gmra.mrb[0].mxu0 %vm1190_vm7, %v1175_v18  ;;  %v1420_v18 = vld [vmem:[%s2452_s5] sm:$0x1] }
 0x43a   : > { %v1176_v19 = vpop.trf.xlu0 }
 0x43b   : > { %1937 = vmatprep.mubr.msk.f32.mxu0 %vm1190_vm7, %v1176_v19 }
 0x43e   : > { %v1177_v20 = vpop.trf.xlu0 }
 0x43f   : > { %1938 = vmatmul.mubr.msk.f32.gmra.mrb[2].mxu0 %vm1190_vm7, %v1177_v20 }
 0x442   : > { %v1178_v21 = vpop.trf.xlu0 }
 0x443   : > { %1940 = vmatprep.mubr.msk.f32.mxu0 %vm1190_vm7, %v1178_v21 }
 0x446   : > { %v1179_v22 = vpop.trf.xlu0 }
 0x447   : > { %1941 = vmatmul.mubr.msk.f32.gmra.mrb[4].mxu0 %vm1190_vm7, %v1179_v22 }
 0x44a   : > { %v1180_v23 = vpop.trf.xlu0 }
 0x44b   : > { %1943 = vmatprep.mubr.msk.f32.mxu0 %vm1190_vm7, %v1180_v23 }
 0x44e   : > { %v1181_v24 = vpop.trf.xlu0 }
 0x44f   : > { %1944 = vmatmul.mubr.msk.f32.gmra.mrb[6].mxu0 %vm1190_vm7, %v1181_v24 }
 0x452   : > { %v1182_v25 = vpop.trf.xlu0 }
 0x453   : > { %1946 = vmatprep.mubr.msk.f32.mxu0 %vm1190_vm7, %v1182_v25 }
 0x456   : > { %v1183_v26 = vpop.trf.xlu0 }
 0x457   : > { %1947 = vmatmul.mubr.msk.f32.gmra.mrb[8].mxu0 %vm1190_vm7, %v1183_v26 }
 0x45a   : > { %v1184_v27 = vpop.trf.xlu0 }
 0x45b   : > { %1949 = vmatprep.mubr.msk.f32.mxu1 %vm1190_vm7, %v1184_v27 }
 0x45e   : > { %v1185_v28 = vpop.trf.xlu0 }
 0x45f   : > { %1950 = vmatmul.mubr.msk.f32.vlgmr.msra.gmra.mrb[0].mxu1 %vm1190_vm7, %v1185_v28 }
 0x460   : > { %1959 = vmatpush3.msk.msra.mxu1 %vm1239_vm6, %v1141_v15 }
 0x462   : > { %v1186_v29 = vpop.trf.xlu0 }
 0x463   : > { %1952 = vmatprep.mubr.msk.f32.mxu1 %vm1190_vm7, %v1186_v29 }
 0x466   : > { %v1187_v30 = vpop.trf.xlu0 }
 0x467   : > { %1953 = vmatmul.mubr.msk.f32.gmra.mrb[2].mxu1 %vm1190_vm7, %v1187_v30 }
 0x46a   : > { %v1188_v31 = vpop.trf.xlu0 }
 0x46b   : > { %1955 = vmatprep.mubr.msk.f32.mxu1 %vm1190_vm7, %v1188_v31 }
 0x46e   : > { %v1189_v32 = vpop.trf.xlu0 }
 0x46f   : > { %1956 = vmatmul.mubr.msk.f32.gmra.mrb[4].mxu1 %vm1190_vm7, %v1189_v32 }
 0x470   : > { %1960 = vmatprep.mubr.msk.f32.mxu1 %vm2273_vm8, %v2272_v16 }
 0x473   : > { %1961 = vmatmul.mubr.msk.f32.vlgmr.msra.gmra.mrb[6].mxu1 %vm1190_vm7, %v2274_v33 }
 0x50a   : > { %v1936_v36 = vpop.f32.mrb[0].mxu0 }
 0x50b   : > { %v1389_v37 = vadd.f32 %v1936_v36, %v1143_v34  ;;  %v1309_v38 = vpop.f32.mrb[1].mxu0 }
 0x50c   : > { %v1388_v39 = vadd.f32 %v1309_v38, %v1142_v35 }
 0x50d   : > { %1405 = vst [vmem:[%s2449_s28 + $0x8] sm:$0xff] %v1389_v37 }
 0x50e   : > { %1404 = vst [vmem:[%s2449_s28] sm:$0xff] %v1388_v39 }
 0x512   : > { %v1939_v42 = vpop.f32.mrb[2].mxu0 }
 0x513   : > { %v1391_v43 = vadd.f32 %v1939_v42, %v1145_v40  ;;  %v1319_v44 = vpop.f32.mrb[3].mxu0 }
 0x514   : > { %v1390_v45 = vadd.f32 %v1319_v44, %v1144_v41 }
 0x515   : > { %1407 = vst [vmem:[%s2449_s28 + $0x18] sm:$0xff] %v1391_v43 }
 0x516   : > { %1406 = vst [vmem:[%s2449_s28 + $0x10] sm:$0xff] %v1390_v45 }
 0x51a   : > { %v1942_v48 = vpop.f32.mrb[4].mxu0 }
 0x51b   : > { %v1393_v49 = vadd.f32 %v1942_v48, %v1147_v46  ;;  %v1329_v50 = vpop.f32.mrb[5].mxu0 }
 0x51c   : > { %v1392_v51 = vadd.f32 %v1329_v50, %v1146_v47 }
 0x51d   : > { %1409 = vst [vmem:[%s2449_s28 + $0x28] sm:$0xff] %v1393_v49 }
 0x51e   : > { %1408 = vst [vmem:[%s2449_s28 + $0x20] sm:$0xff] %v1392_v51 }
 0x522   : > { %v1945_v54 = vpop.f32.mrb[6].mxu0 }
 0x523   : > { %v1395_v55 = vadd.f32 %v1945_v54, %v1149_v52  ;;  %v1339_v56 = vpop.f32.mrb[7].mxu0 }
 0x524   : > { %v1394_v57 = vadd.f32 %v1339_v56, %v1148_v53 }
 0x525   : > { %1411 = vst [vmem:[%s2449_s28 + $0x38] sm:$0xff] %v1395_v55 }
 0x526   : > { %1410 = vst [vmem:[%s2449_s28 + $0x30] sm:$0xff] %v1394_v57 }
 0x52a   : > { %v1948_v60 = vpop.f32.mrb[8].mxu0 }
 0x52b   : > { %v1397_v61 = vadd.f32 %v1948_v60, %v1151_v58  ;;  %v1349_v62 = vpop.f32.mrb[9].mxu0 }
 0x52c   : > { %v1396_v63 = vadd.f32 %v1349_v62, %v1150_v59 }
 0x52d   : > { %1413 = vst [vmem:[%s2449_s28 + $0x48] sm:$0xff] %v1397_v61 }
 0x52e   : > { %1412 = vst [vmem:[%s2449_s28 + $0x40] sm:$0xff] %v1396_v63 }
 0x532   : > { %v1951_v2 = vpop.f32.mrb[0].mxu1 }
 0x533   : > { %v1399_v3 = vadd.f32 %v1951_v2, %v1153_v0  ;;  %v1359_v4 = vpop.f32.mrb[1].mxu1 }
 0x534   : > { %v1398_v5 = vadd.f32 %v1359_v4, %v1152_v1 }
 0x535   : > { %1415 = vst [vmem:[%s2449_s28 + $0x58] sm:$0xff] %v1399_v3 }
 0x536   : > { %1414 = vst [vmem:[%s2449_s28 + $0x50] sm:$0xff] %v1398_v5 }
 0x53a   : > { %v1954_v8 = vpop.f32.mrb[2].mxu1 }
 0x53b   : > { %v1401_v9 = vadd.f32 %v1954_v8, %v1155_v6  ;;  %v1369_v10 = vpop.f32.mrb[3].mxu1 }
 0x53c   : > { %v1400_v11 = vadd.f32 %v1369_v10, %v1154_v7 }
 0x53d   : > { %1417 = vst [vmem:[%s2449_s28 + $0x68] sm:$0xff] %v1401_v9 }
 0x53e   : > { %1416 = vst [vmem:[%s2449_s28 + $0x60] sm:$0xff] %v1400_v11 }
 0x542   : > { %v1957_v14 = vpop.f32.mrb[4].mxu1 }
 0x543   : > { %v1403_v15 = vadd.f32 %v1957_v14, %v1157_v12  ;;  %v1379_v16 = vpop.f32.mrb[5].mxu1 }
 0x544   : > { %v1402_v17 = vadd.f32 %v1379_v16, %v1156_v13 }
 0x545   : > { %1419 = vst [vmem:[%s2449_s28 + $0x78] sm:$0xff] %v1403_v15 }
 0x546   : > { %1418 = vst [vmem:[%s2449_s28 + $0x70] sm:$0xff] %v1402_v17  ;;  %v1490_v19 = vpop.f32.mrb[6].mxu1 }
 0x547   : > { %v1494_v20 = vadd.f32 %v1490_v19, %v1420_v18  ;;  %v1962_v21 = vpop.f32.mrb[7].mxu1 }
 0x549   : > { %1495 = vst [vmem:[%s2452_s5] sm:$0x1] %v1494_v20 }
 0x54a PF: > { %s1812_s7 = sshll.u32 %s2249_s19, 11  ;;  %s1514_s14 = sshll.u32 %s2449_s28, 4  ;;  %s2656_s14 = int_to_ptr.vmem [resolvable:$true] %s1514_s14 }
 0x54b   : > { %s2653_s12 = scalar_lea.hbm %s2738_s3, %s1812_s7  ;;  %s1497_s23 = scalar_lea.sflag [#allocation4], %s2442_s8 }
 0x54c   : > { %s2127_s11 = scalar_lea.vmem %s2656_s14, 2048  ;;  %p2755_p1 = scmp.ne.s32.totalorder %s2746_s29, 0 }
 0x54d   : > { %p2128_p13 = scmp.ne.s32.totalorder %s2656_s14, %s2127_s11  ;;  %s2275_s13 = smov [#allocation7]  }
 0x54e   : > { %s2131_s24 = sshll.u32 %s2275_s13, 4  ;;  %s2132_s24 = int_to_ptr.vmem [resolvable:$false] %s2131_s24 }
 0x54f   : > { %p2129_p2 = pnand %p2128_p13, %p2755_p1  ;;  %s2133_s18 = scalar_lea.vmem %s2132_s24, 4096 }
 0x550   : > { %p2134_p12 = scmp.lt.s32.totalorder %s2656_s14, %s2132_s24  ;;  %p2135_p0 = scmp.lt.s32.totalorder %s2133_s18, %s2127_s11 }
 0x551   : > { %p2130_p7 = pneg %p2129_p2 }
 0x552   : > { %p2136_p3 = por %p2135_p0, %p2134_p12 }
 0x554   : > { %p2137_p9 = pnand %p2136_p3, %p2130_p7 }
 0x556   : > { %2140 = shalt.err (!%p2137_p9)
}
 0x557   : > { %s2141_s28 = scalar_lea.hbm %s2653_s12, 2048  ;;  %s2145_s6 = scalar_lea.hbm %s2738_s3, 4096 }
 0x558   : > { %p2142_p4 = scmp.ne.s32.totalorder %s2653_s12, %s2141_s28  ;;  %p2146_p8 = scmp.lt.u32.totalorder %s2653_s12, %s2738_s3 }
 0x559   : > { %p2147_p10 = scmp.lt.u32.totalorder %s2145_s6, %s2141_s28  ;;  %p2149_p13 = scmp.lt.u32.totalorder %s2141_s28, %s2653_s12 }
 0x55a   : > { %p2143_p5 = pnand %p2142_p4, %p2755_p1 }
 0x55b   : > { %p2148_p11 = por %p2147_p10, %p2146_p8 }
 0x55c   : > { %p2144_p6 = pneg %p2143_p5 }
 0x55d   : > { %p2150_p2 = por %p2149_p13, %p2148_p11 }
 0x55f   : > { %p2151_p7 = pnand %p2150_p2, %p2144_p6 }
 0x561   : > { %2154 = shalt.err (!%p2151_p7)
}
 0x562   : > { %s2276_s11 = smov 128   ;;  %s2277_s24 = smov 8  }
 0x563   : > { %1973 = dma.vmem_to_hbm [thread:$0]  (%p2755_p1), %s2656_s14, 2048, %s2653_s12, %s1497_s23, %s2276_s11, %s2276_s11, %s2277_s24  }
 0x564   : > { %s1809_s18 = sshll.u32 %s2249_s19, 4  ;;  %s1530_s27 = sshll.u32 %s2452_s5, 4  ;;  %s1531_s27 = int_to_ptr.vmem [resolvable:$true] %s1530_s27 }
 0x565   : > { %s2687_s6 = scalar_lea.hbm %s2739_s4, %s1809_s18  ;;  %s1502_s10 = scalar_lea.sflag [#allocation9], %s2442_s8 }
 0x566   : > { %s2155_s13 = scalar_lea.vmem %s1531_s27, 16  ;;  %s2278_s0 = smov [#allocation8]  }
 0x567   : > { %p2156_p12 = scmp.ne.s32.totalorder %s1531_s27, %s2155_s13  ;;  %s2159_s1 = sshll.u32 %s2278_s0, 4  ;;  %s2160_s1 = int_to_ptr.vmem [resolvable:$false] %s2159_s1 }
 0x568   : > { %s2161_s2 = scalar_lea.vmem %s2160_s1, 32  ;;  %p2162_p9 = scmp.lt.s32.totalorder %s1531_s27, %s2160_s1 }
 0x569   : > { %p2157_p0 = pnand %p2156_p12, %p2755_p1  ;;  %p2163_p4 = scmp.lt.s32.totalorder %s2161_s2, %s2155_s13 }
 0x56b   : > { %p2158_p3 = pneg %p2157_p0  ;;  %p2164_p5 = por %p2163_p4, %p2162_p9 }
 0x56d   : > { %p2165_p6 = pnand %p2164_p5, %p2158_p3 }
 0x56f   : > { %2168 = shalt.err (!%p2165_p6)
}
 0x570   : > { %s2169_s19 = scalar_lea.hbm %s2687_s6, 16  ;;  %s2173_s0 = scalar_lea.hbm %s2739_s4, 32 }
 0x571   : > { %p2170_p8 = scmp.ne.s32.totalorder %s2687_s6, %s2169_s19  ;;  %p2174_p13 = scmp.lt.u32.totalorder %s2687_s6, %s2739_s4 }
 0x572   : > { %p2175_p2 = scmp.lt.u32.totalorder %s2173_s0, %s2169_s19  ;;  %p2177_p12 = scmp.lt.u32.totalorder %s2169_s19, %s2687_s6 }
 0x573   : > { %p2171_p10 = pnand %p2170_p8, %p2755_p1 }
 0x574   : > { %p2176_p7 = por %p2175_p2, %p2174_p13 }
 0x575   : > { %p2172_p11 = pneg %p2171_p10 }
 0x576   : > { %p2178_p0 = por %p2177_p12, %p2176_p7 }
 0x578   : > { %p2179_p3 = pnand %p2178_p0, %p2172_p11 }
 0x57a   : > { %2182 = shalt.err (!%p2179_p3)
}
 0x57b   : > { %1974 = dma.vmem_to_hbm [thread:$0]  (%p2755_p1), %s1531_s27, 16, %s2687_s6, %s1502_s10  }
 0x57c PF: > { %p1992_p9 = scmp.ge.s32.totalorder %s2261_s22, 2  ;;  %s1542_s2 = sand.u32 1, %s2233_s15  }
 0x57d   : > { %p2756_p4 = scmp.ne.s32.totalorder %s2747_s30, 0  ;;  %s1543_s14 = scalar_lea.sflag [#allocation4], %s1542_s2 }
 0x57f   : > { %p1985_p5 = pnand %p1992_p9, %p2756_p4 }
 0x581   : > { %2224 = dma.done.wait (!%p1985_p5), %s1543_s14, 2048  }
 0x582   : > { %2226 = vsyncadd (!%p1985_p5), %s1543_s14, 4294965248  ;;  %s1552_s23 = scalar_lea.sflag [#allocation9], %s1542_s2 }
 0x583   : > { %2228 = dma.done.wait (!%p1985_p5), %s1552_s23, 16  }
 0x584   : > { %2230 = vsyncadd (!%p1985_p5), %s1552_s23, 4294967280  ;;  %s27_s22 = sadd.s32 1, %s2261_s22   ;;  %s2757_s15 = smov %s2237_s16 }
 0x585   : > { %p24_p6 = scmp.ge.s32.totalorder %s27_s22, 6   ;;  %s2758_s16 = smov %s2241_s17 }
 0x586   : > { %s2759_s17 = smov %s2381_s9  ;;  %s2760_s18 = smov %s2253_s20 }
 0x587   : > { %s2761_s19 = smov %s2257_s21  ;;  %s2762_s20 = smov %s2765_s25 }
 0x588   : > { %s2763_s21 = smov %s2769_s26  ;;  %26 = sbr.rel (!%p24_p6) target bundleno = 15 (0xf), region = 126 }
 0x58f   :  { %1556 = vsyncpa [#allocation3], 1 }
 0x590   :  { %1558 = vsyncpa [#allocation3 + $0x1], 1 }
 0x591   :  { %1559 = vsyncpa [#allocation6], 1 }
 0x592   :  { %1561 = vsyncpa [#allocation6 + $0x1], 1 }
 0x593   :  { %1562 = vsyncpa [#allocation4], 1 }
 0x594   :  { %1564 = vsyncpa [#allocation4 + $0x1], 1 }
 0x595   :  { %1565 = vsyncpa [#allocation9], 1 }
 0x596   :  { %1567 = vsyncpa [#allocation9 + $0x1], 1 }

</bundles_post_ra>
